<compile_context>
chip_gen: v6e
topology: v6e:2x2x1
jax: 0.10.0
libtpu: 0.0.40
codegen_flags: <defaults>
</compile_context>

<pallas_src>
import jax
import jax.numpy as jnp
from jax.experimental import pallas as pl
from jax.experimental.pallas import tpu as pltpu


def _identity_kernel(x_ref, o_ref):
    # Elementwise "linear activation": out = x (straight whole-tile copy).
    o_ref[...] = x_ref[...]


def _choose_lane(n: int) -> tuple[int, int]:
    """Pick a lane width (multiple of 128) for a flat element count `n`.

    Prefers the widest lane count that divides n while leaving >= 8 rows;
    falls back to any dividing lane count; otherwise pads to a multiple of 128.
    Returns (lane, pad_elements).
    """
    candidates = (4096, 2048, 1024, 512, 256, 128)
    for lane in candidates:
        if n % lane == 0 and n // lane >= 8:
            return lane, 0
    for lane in candidates:
        if n % lane == 0:
            return lane, 0
    lane = 128
    return lane, (-n) % lane


def linear_activation(x: jax.Array) -> jax.Array:
    """Identity forward pass implemented as a Pallas TPU copy kernel."""
    orig_shape = x.shape
    orig_dtype = x.dtype
    n = int(x.size)
    if n == 0:
        return x

    # --- lane-dense flatten -------------------------------------------------
    lane, pad = _choose_lane(n)
    flat = x.reshape(-1)
    if pad:
        flat = jnp.pad(flat, (0, pad))
    n_pad = n + pad
    rows = n_pad // lane
    x2 = flat.reshape(rows, lane)

    # --- tile sizing ---------------------------------------------------------
    itemsize = jnp.dtype(orig_dtype).itemsize
    # Sublane packing: 8 rows for 32-bit, 16 for 16-bit, 32 for 8-bit dtypes.
    pack = max(8, 32 // max(itemsize, 1) * 8 // 8 * (4 // max(itemsize, 1)) // (4 // max(itemsize, 1)) * (4 // max(itemsize, 1)) * 2 // 2 * 4 // 4 * 8 // 8 * (4 // itemsize) if itemsize in (1, 2, 4) else 8)
    pack = {4: 8, 2: 16, 1: 32}.get(itemsize, 8)

    bytes_per_row = lane * itemsize
    target_block_bytes = 4 * 1024 * 1024  # ~4 MiB/block: amortizes ~0.35us/step,
    # and 2 in + 2 out double-buffers (~16 MiB) fit every generation's scoped VMEM.
    tile_r = max(pack, (target_block_bytes // bytes_per_row) // pack * pack)
    tile_r = min(tile_r, rows)

    # Keep the grid >= 2 steps when possible so the "parallel" axis can shard
    # across the two TensorCores on v7x.
    if rows > tile_r or (tile_r == rows and rows >= 2 * pack):
        if pl.cdiv(rows, tile_r) == 1:
            half = -(-rows // 2)
            tile_r = -(-half // pack) * pack
            tile_r = min(tile_r, rows)

    grid = (pl.cdiv(rows, tile_r),)

    out2 = pl.pallas_call(
        _identity_kernel,
        out_shape=jax.ShapeDtypeStruct((rows, lane), orig_dtype),
        grid_spec=pltpu.PrefetchScalarGridSpec(
            num_scalar_prefetch=0,
            grid=grid,
            in_specs=[pl.BlockSpec((tile_r, lane), lambda i: (i, 0))],
            out_specs=pl.BlockSpec((tile_r, lane), lambda i: (i, 0)),
        ),
        input_output_aliases={0: 0},
        cost_estimate=pl.CostEstimate(
            flops=0,
            transcendentals=0,
            bytes_accessed=2 * n_pad * itemsize,
        ),
        compiler_params=pltpu.CompilerParams(
            dimension_semantics=("parallel",),
            vmem_limit_bytes=32 * 1024 * 1024,
        ),
    )(x2)

    out = out2.reshape(-1)
    if pad:
        out = out[:n]
    return out.reshape(orig_shape)


if __name__ == "__main__":
    key = jax.random.PRNGKey(0)
    # NCHW input, small shapes: batch=2, channels=4, spatial=16x16
    x = jax.random.normal(key, (2, 4, 16, 16), dtype=jnp.float32)

    y = linear_activation(x)
    y = jax.block_until_ready(y)

    assert y.shape == x.shape, f"shape mismatch: {y.shape} vs {x.shape}"
    assert y.dtype == x.dtype, f"dtype mismatch: {y.dtype} vs {x.dtype}"
    assert bool(jnp.all(y == x)), "identity kernel output differs from input"

    print("KERNEL_OK")
</pallas_src>

<mosaic_0001>
module attributes {stable_mosaic.version = 11 : i64} {
  func.func @_identity_kernel(%arg0: i32, %arg1: memref<8x256xf32, #tpu.memory_space<vmem>>, %arg2: memref<8x256xf32, #tpu.memory_space<vmem>>) attributes {dimension_semantics = [#tpu.dimension_semantics<parallel>], iteration_bounds = array<i64: 1>, scalar_prefetch = 0 : i64, scratch_operands = 0 : i64, tpu.core_type = #tpu.core_type<tc>, window_params = [{transform_indices = @transform_0, window_bounds = array<i64: 8, 256>}, {transform_indices = @transform_1, window_bounds = array<i64: 8, 256>}]} {
    %c0 = arith.constant 0 : index
    %c0_0 = arith.constant 0 : index
    %0 = vector.load %arg1[%c0, %c0_0] : memref<8x256xf32, #tpu.memory_space<vmem>>, vector<8x256xf32>
    %c0_1 = arith.constant 0 : index
    %c0_2 = arith.constant 0 : index
    %1 = vector.load %arg2[%c0_1, %c0_2] : memref<8x256xf32, #tpu.memory_space<vmem>>, vector<8x256xf32>
    tpu.vector_store %arg2[%c0_1, %c0_2], %0 {strides = array<i32>} : memref<8x256xf32, #tpu.memory_space<vmem>>, vector<8x256xf32>,
    return
  }
  func.func @transform_0(%arg0: i32) -> (i32, i32) {
    %c0_i32 = arith.constant 0 : i32
    %c0_i32_0 = arith.constant 0 : i32
    return %arg0, %c0_i32 : i32, i32
  }
  func.func @transform_1(%arg0: i32) -> (i32, i32) {
    %c0_i32 = arith.constant 0 : i32
    %c0_i32_0 = arith.constant 0 : i32
    return %arg0, %c0_i32 : i32, i32
  }
}

</mosaic_0001>

<bundles_post_ra>
// kernel: tpu_custom_call.1
= control target key start
LH: loop header
LB: loop body
LE: loop exit
PB: predicated region body
PF: predicated region fallthrough
CT: control target
= control target key end

     0   :  { %6 = vsyncpa [#allocation3], 0  ;;  %s104_s0 = inlined_call_operand.hbm [shape: f32[8,256], index: 0, kind: input, shape index: {}, may-alias: {0,1}]   ;;  %s105_s1 = inlined_call_operand.hbm [shape: f32[8,256], index: 1, kind: output, shape index: {}, may-alias: {0,1}]  }
   0x1   :  { %7 = vsyncpa [#allocation4], 0  ;;  %s86_s6 = smov [#allocation2]  }
   0x2   :  { %s14_s7 = sshll.u32 %s86_s6, 4  ;;  %s15_s7 = int_to_ptr.vmem [resolvable:$true] %s14_s7 }
   0x3   :  { %s50_s8 = scalar_lea.vmem %s15_s7, 256  ;;  %p55_p1 = scmp.lt.s32.totalorder %s15_s7, %s15_s7 }
   0x4   :  { %p51_p0 = scmp.ne.s32.totalorder %s15_s7, %s50_s8  ;;  %p56_p2 = scmp.lt.s32.totalorder %s50_s8, %s50_s8 }
   0x6   :  { %p57_p3 = por %p56_p2, %p55_p1 }
   0x8   :  { %p58_p4 = pnand %p57_p3, %p51_p0 }
   0xa   :  { %61 = shalt.err (!%p58_p4)
}
   0xb   :  { %17 = dma.hbm_to_vmem [thread:$0]  %s104_s0, 256, %s15_s7, [#allocation3]  }
   0xc   :  { %82 = dma.done.wait [#allocation3], 256  }
   0xd   :  { %83 = vsyncadd [#allocation3], 4294967040  ;;  %s87_s11 = smov [#allocation5]   ;;  %v21_v0 = vld [vmem:[#allocation2] sm:$0xff]  ;;  %v22_v1 = vld [vmem:[#allocation2 + $0x8] sm:$0xff] }
   0xe   :  { %s31_s12 = sshll.u32 %s87_s11, 4  ;;  %23 = vst [vmem:[#allocation5] sm:$0xff] %v21_v0  ;;  %24 = vst [vmem:[#allocation5 + $0x8] sm:$0xff] %v22_v1  ;;  %s32_s12 = int_to_ptr.vmem [resolvable:$true] %s31_s12 }
   0xf   :  { %s62_s13 = scalar_lea.vmem %s32_s12, 256  ;;  %p67_p6 = scmp.lt.s32.totalorder %s32_s12, %s32_s12 }
  0x10   :  { %p63_p5 = scmp.ne.s32.totalorder %s32_s12, %s62_s13  ;;  %p68_p7 = scmp.lt.s32.totalorder %s62_s13, %s62_s13 }
  0x12   :  { %p69_p8 = por %p68_p7, %p67_p6 }
  0x14   :  { %p70_p9 = pnand %p69_p8, %p63_p5 }
  0x16   :  { %73 = shalt.err (!%p70_p9)
}
  0x17   :  { %34 = dma.vmem_to_hbm [thread:$0]  %s32_s12, 256, %s105_s1, [#allocation4]  }
  0x18   :  { %84 = dma.done.wait [#allocation4], 256  }
  0x19   :  { %85 = vsyncadd [#allocation4], 4294967040 }
  0x1a   :  { %38 = vsyncpa [#allocation3], 1 }
  0x1b   :  { %39 = vsyncpa [#allocation4], 1 }

</bundles_post_ra>
